<compile_context>
chip_gen: v7x
topology: tpu7x:2x2x1
jax: 0.10.0
libtpu: 0.0.40
codegen_flags: <defaults>
</compile_context>

<pallas_src>
import functools
import warnings

import jax
import jax.numpy as jnp
from jax.experimental import pallas as pl
from jax.experimental.pallas import tpu as pltpu


def _kernel_flat(x_ref, o_ref):
    # x_ref: (bb, C, HW)    -> lane-dense load  (last dim = HW)
    # o_ref: (bb, 1, HW*C)  -> lane-dense, unmasked store (last dim = HW*C)
    bb, c, hw = x_ref.shape
    y = jnp.transpose(x_ref[...], (0, 2, 1))   # (bb, HW, C): minor-dims (XLU) transpose
    # TODO(synk): verify on the deployed toolchain that this minor-dim-merging
    # reshape does not materialize an extra VMEM relayout for small C; if it
    # does, restructure to per-128-lane-chunk interleaving so the kernel stays
    # DMA-bound.
    o_ref[...] = y.reshape(bb, 1, hw * c)      # row-major merge == torch reshape bytes


def _kernel_nhwc(x_ref, o_ref):
    # Fallback only (lane-sparse stores when C < 128): o_ref is (bb, HW, C).
    o_ref[...] = jnp.transpose(x_ref[...], (0, 2, 1))


@functools.lru_cache(maxsize=None)
def _is_multi_tensorcore():
    """True on chips where the 'parallel' grid axis shards across >1 TensorCore."""
    try:
        kind = jax.devices()[0].device_kind.lower()
    except Exception:
        return False
    return any(tag in kind for tag in ("v7", "v4", "v3"))


def _pick_batch_block(b, per_batch_bytes, *, multi_tc, target_bytes=4 << 20):
    """Batch rows per grid step: ~target-sized input blocks.  On multi-TC chips
    keep >= 2 grid steps with an even step count so both cores get equal work;
    on single-TC chips just take the biggest block that meets the byte target."""
    bb = int(max(1, min(b, target_bytes // max(per_batch_bytes, 1))))
    if multi_tc and b >= 2:
        bb = min(bb, pl.cdiv(b, 2))          # at least 2 grid steps
        for d in range(bb, 0, -1):           # prefer an even step count
            if pl.cdiv(b, d) % 2 == 0:
                bb = d
                break
    return bb


def _build_call(kernel, b, c, hw, bb, out_tail, dtype):
    itemsize = jnp.dtype(dtype).itemsize
    block_bytes = bb * c * hw * itemsize
    # in + out blocks, each double-buffered, plus headroom for Mosaic internal
    # scratch; capped at 48 MiB so it is safe on v7x (64 MiB physical VMEM).
    vmem_limit = int(min(48 << 20, max(16 << 20, 4 * block_bytes + (4 << 20))))
    return pl.pallas_call(
        kernel,
        out_shape=jax.ShapeDtypeStruct((b,) + out_tail, dtype),
        grid_spec=pltpu.PrefetchScalarGridSpec(
            num_scalar_prefetch=0,
            grid=(pl.cdiv(b, bb),),
            in_specs=[pl.BlockSpec((bb, c, hw), lambda i: (i, 0, 0))],
            out_specs=pl.BlockSpec((bb,) + out_tail, lambda i: (i, 0, 0)),
        ),
        compiler_params=pltpu.CompilerParams(
            dimension_semantics=("parallel",),
            vmem_limit_bytes=vmem_limit,
        ),
        cost_estimate=pl.CostEstimate(
            flops=0,
            transcendentals=0,
            bytes_accessed=2 * b * c * hw * itemsize,
        ),
    )


@functools.lru_cache(maxsize=None)
def _get_call(b, c, hw, dtype_name):
    """Build (and cache) the pallas_call for this shape/dtype, deciding ONCE
    whether the lane-dense flat-slab kernel lowers on this toolchain."""
    dtype = jnp.dtype(dtype_name)
    bb = _pick_batch_block(b, c * hw * dtype.itemsize, multi_tc=_is_multi_tensorcore())
    flat_call = _build_call(_kernel_flat, b, c, hw, bb, (1, hw * c), dtype)
    try:
        # One-time AOT compile probe: Mosaic lowering errors surface here, not
        # per call.  The result (which variant to use) is cached.
        jax.jit(flat_call).lower(jax.ShapeDtypeStruct((b, c, hw), dtype)).compile()
        return flat_call, True
    except Exception as err:  # toolchain dependent
        warnings.warn(
            "PatchEmbed_noconv: lane-dense flat-output kernel failed to compile "
            f"({err!r}); falling back to a lane-sparse (B, HW, C) store kernel, "
            "which is substantially slower.")
        return _build_call(_kernel_nhwc, b, c, hw, bb, (hw, c), dtype), False


def patch_embed_noconv(x, *, min_pallas_bytes=1 << 20):
    """x: (B, C, H, W) -> (B, H*W, C).  Pure layout transform (PatchEmbed_noconv.forward)."""
    b, c, h, w = x.shape
    hw = h * w
    total_bytes = b * c * hw * jnp.dtype(x.dtype).itemsize
    if total_bytes < min_pallas_bytes:
        # Tiny inputs: pallas_call launch + pipeline prologue costs more than the
        # whole copy; plain XLA fused copy-transpose wins outright.
        return jnp.transpose(x, (0, 2, 3, 1)).reshape(b, hw, c)

    call, is_flat = _get_call(b, c, hw, jnp.dtype(x.dtype).name)
    x2 = x.reshape(b, c, hw)                 # free view; makes kernel loads lane-dense
    out = call(x2)
    if is_flat:
        out = out.reshape(b, hw, c)          # free: identical row-major bytes
    # TODO(synk): norm_layer is None by default; if provided, fuse the LayerNorm
    # over C (and/or the real projection matmul) into the kernel after the
    # transpose to beat the pure-copy HBM roofline.
    return out


def init_params(patch_size=4, in_chans=4, embed_dim=96, seed=0):
    """Deterministic init of the module's parameters (proj is unused in forward)."""
    key = jax.random.PRNGKey(seed)
    kw, kb = jax.random.split(key)
    fan_in = in_chans * patch_size * patch_size
    bound = 1.0 / jnp.sqrt(fan_in)
    proj_weight = jax.random.uniform(
        kw, (embed_dim, in_chans, patch_size, patch_size),
        minval=-bound, maxval=bound, dtype=jnp.float32)
    proj_bias = jax.random.uniform(
        kb, (embed_dim,), minval=-bound, maxval=bound, dtype=jnp.float32)
    return {"proj_weight": proj_weight, "proj_bias": proj_bias}


if __name__ == "__main__":
    B, C, H, W = 2, 4, 16, 16
    key = jax.random.PRNGKey(0)
    x = jax.random.normal(key, (B, C, H, W), dtype=jnp.float32)

    _ = init_params(patch_size=4, in_chans=C, embed_dim=96, seed=0)  # unused in forward

    # Force the Pallas path even at this tiny demo shape so the kernel runs.
    out = patch_embed_noconv(x, min_pallas_bytes=0)
    out = jax.block_until_ready(out)

    # Reference (pure JAX, mirrors torch permute + reshape).
    ref = jnp.transpose(x, (0, 2, 3, 1)).reshape(B, H * W, C)
    assert out.shape == (B, H * W, C), out.shape
    assert out.dtype == x.dtype
    assert jnp.allclose(out, ref), "mismatch vs reference (pallas path)"

    # Default path (small-input early-out -> plain XLA) must agree too.
    out_default = jax.block_until_ready(patch_embed_noconv(x))
    assert jnp.allclose(out_default, ref), "mismatch vs reference (xla path)"

    # Non-divisible batch exercises the cdiv-padded last block.
    x3 = jax.random.normal(jax.random.PRNGKey(1), (3, C, H, W), dtype=jnp.float32)
    out3 = jax.block_until_ready(patch_embed_noconv(x3, min_pallas_bytes=0))
    ref3 = jnp.transpose(x3, (0, 2, 3, 1)).reshape(3, H * W, C)
    assert jnp.allclose(out3, ref3), "mismatch vs reference (padded last block)"

    print("KERNEL_OK")
</pallas_src>

<mosaic_0001>
module attributes {stable_mosaic.version = 11 : i64} {
  func.func @_kernel_nhwc(%arg0: i32, %arg1: memref<2x4x256xf32, #tpu.memory_space<vmem>>, %arg2: memref<2x256x4xf32, #tpu.memory_space<vmem>>) attributes {dimension_semantics = [#tpu.dimension_semantics<parallel>], iteration_bounds = array<i64: 1>, scalar_prefetch = 0 : i64, scratch_operands = 0 : i64, tpu.core_type = #tpu.core_type<tc>, window_params = [{transform_indices = @transform_0, window_bounds = array<i64: 2, 4, 256>}, {transform_indices = @transform_1, window_bounds = array<i64: 2, 256, 4>}]} {
    %c0 = arith.constant 0 : index
    %c0_0 = arith.constant 0 : index
    %c0_1 = arith.constant 0 : index
    %0 = vector.load %arg1[%c0, %c0_0, %c0_1] : memref<2x4x256xf32, #tpu.memory_space<vmem>>, vector<2x4x256xf32>
    %1 = tpu.transpose %0, [0, 2, 1] : vector<2x4x256xf32> -> vector<2x256x4xf32>
    %c0_2 = arith.constant 0 : index
    %c0_3 = arith.constant 0 : index
    %c0_4 = arith.constant 0 : index
    %2 = vector.load %arg2[%c0_2, %c0_3, %c0_4] : memref<2x256x4xf32, #tpu.memory_space<vmem>>, vector<2x256x4xf32>
    tpu.vector_store %arg2[%c0_2, %c0_3, %c0_4], %1 {strides = array<i32>} : memref<2x256x4xf32, #tpu.memory_space<vmem>>, vector<2x256x4xf32>,
    return
  }
  func.func @transform_0(%arg0: i32) -> (i32, i32, i32) {
    %c0_i32 = arith.constant 0 : i32
    %c0_i32_0 = arith.constant 0 : i32
    %c0_i32_1 = arith.constant 0 : i32
    return %arg0, %c0_i32, %c0_i32_0 : i32, i32, i32
  }
  func.func @transform_1(%arg0: i32) -> (i32, i32, i32) {
    %c0_i32 = arith.constant 0 : i32
    %c0_i32_0 = arith.constant 0 : i32
    %c0_i32_1 = arith.constant 0 : i32
    return %arg0, %c0_i32, %c0_i32_0 : i32, i32, i32
  }
}

</mosaic_0001>

<bundles_post_ra>
// kernel: tpu_custom_call.1
= control target key start
LH: loop header
LB: loop body
LE: loop exit
PB: predicated region body
PF: predicated region fallthrough
CT: control target
= control target key end

     0   :  { %6 = vsyncpa [#allocation3], 0  ;;  %s258_s6 = smov [#allocation2]   ;;  %s539_s0 = inlined_call_operand.hbm [shape: f32[2,4,256], index: 0, kind: input, shape index: {}]   ;;  %s540_s1 = inlined_call_operand.vmem [shape: f32[2,256,4], index: 1, kind: output, shape index: {}]  }
   0x1   :  { %s12_s7 = sshll.u32 %s258_s6, 4  ;;  %s234_s10 = scalar_lea.hbm %s539_s0, 256  ;;  %s13_s7 = int_to_ptr.vmem [resolvable:$true] %s12_s7 }
   0x2   :  { %p235_p0 = scmp.ne.s32.totalorder %s539_s0, %s234_s10  ;;  %p238_p1 = scmp.lt.u32.totalorder %s234_s10, %s539_s0 }
   0x4   :  { %p240_p2 = pnand %p238_p1, %p235_p0 }
   0x6   :  { %243 = shalt.err (!%p240_p2)
}
   0x7   :  { %s244_s15 = scalar_lea.vmem %s13_s7, 256  ;;  %p249_p4 = scmp.lt.s32.totalorder %s13_s7, %s13_s7 }
   0x8   :  { %p245_p3 = scmp.ne.s32.totalorder %s13_s7, %s244_s15  ;;  %p250_p5 = scmp.lt.s32.totalorder %s244_s15, %s244_s15 }
   0xa   :  { %p251_p6 = por %p250_p5, %p249_p4 }
   0xc   :  { %p252_p7 = pnand %p251_p6, %p245_p3 }
   0xe   :  { %255 = shalt.err (!%p252_p7)
}
   0xf   :  { %s259_s16 = smov 128   ;;  %s260_s17 = smov 8  }
  0x10   :  { %18 = dma.hbm_to_vmem [thread:$0]  %s539_s0, 256, %s13_s7, [#allocation3], %s259_s16, %s259_s16, %s260_s17  }
  0x11   :  { %256 = dma.done.wait [#allocation3], 256  }
  0x12   :  { %257 = vsyncadd [#allocation3], 4294967040  ;;  %v23_v0 = vld [vmem:[#allocation2 + $0x8] sm:$0xff]  ;;  %v22_v1 = vld [vmem:[#allocation2] sm:$0xff]  ;;  %vm158_vm0 = vcmask 31744  }
  0x13   :  { %94 = vxpose.xlu1.b32.start.end [1/1] (short) %v23_v0, 128  ;;  %30 = vxpose.xlu0.b32.start.end [1/1] (short) %v22_v1, 128  ;;  %v27_v2 = vcombine.high %v23_v0, %v23_v0  ;;  %v26_v3 = vcombine.high %v22_v1, %v22_v1 }
  0x50   :  { %126 = vxpose.xlu1.b32.start.end [1/1] (short) %v27_v2, 128  ;;  %62 = vxpose.xlu0.b32.start.end [1/1] (short) %v26_v3, 128 }
  0x93   :  { %v110_v4 = vpop.trf.xlu1  ;;  %v46_v5 = vpop.trf.xlu0 }
  0x94   :  { %191 = vst.msk [vmem:[%s540_s1 + $0x100] sm:$0xff] %vm158_vm0, %v110_v4  ;;  %159 = vst.msk [vmem:[%s540_s1] sm:$0xff] %vm158_vm0, %v46_v5 }
  0x97   :  { %v111_v6 = vpop.trf.xlu1  ;;  %v47_v7 = vpop.trf.xlu0 }
  0x98   :  { %192 = vst.msk [vmem:[%s540_s1 + $0x108] sm:$0xff] %vm158_vm0, %v111_v6  ;;  %160 = vst.msk [vmem:[%s540_s1 + $0x8] sm:$0xff] %vm158_vm0, %v47_v7 }
  0x9b   :  { %v112_v8 = vpop.trf.xlu1  ;;  %v48_v9 = vpop.trf.xlu0 }
  0x9c   :  { %193 = vst.msk [vmem:[%s540_s1 + $0x110] sm:$0xff] %vm158_vm0, %v112_v8  ;;  %161 = vst.msk [vmem:[%s540_s1 + $0x10] sm:$0xff] %vm158_vm0, %v48_v9 }
  0x9f   :  { %v113_v10 = vpop.trf.xlu1  ;;  %v49_v11 = vpop.trf.xlu0 }
  0xa0   :  { %194 = vst.msk [vmem:[%s540_s1 + $0x118] sm:$0xff] %vm158_vm0, %v113_v10  ;;  %162 = vst.msk [vmem:[%s540_s1 + $0x18] sm:$0xff] %vm158_vm0, %v49_v11 }
  0xa3   :  { %v114_v12 = vpop.trf.xlu1  ;;  %v50_v13 = vpop.trf.xlu0 }
  0xa4   :  { %195 = vst.msk [vmem:[%s540_s1 + $0x120] sm:$0xff] %vm158_vm0, %v114_v12  ;;  %163 = vst.msk [vmem:[%s540_s1 + $0x20] sm:$0xff] %vm158_vm0, %v50_v13 }
  0xa7   :  { %v115_v14 = vpop.trf.xlu1  ;;  %v51_v15 = vpop.trf.xlu0 }
  0xa8   :  { %196 = vst.msk [vmem:[%s540_s1 + $0x128] sm:$0xff] %vm158_vm0, %v115_v14  ;;  %164 = vst.msk [vmem:[%s540_s1 + $0x28] sm:$0xff] %vm158_vm0, %v51_v15 }
  0xab   :  { %v116_v16 = vpop.trf.xlu1  ;;  %v52_v17 = vpop.trf.xlu0 }
  0xac   :  { %197 = vst.msk [vmem:[%s540_s1 + $0x130] sm:$0xff] %vm158_vm0, %v116_v16  ;;  %165 = vst.msk [vmem:[%s540_s1 + $0x30] sm:$0xff] %vm158_vm0, %v52_v17 }
  0xaf   :  { %v117_v18 = vpop.trf.xlu1  ;;  %v53_v19 = vpop.trf.xlu0 }
  0xb0   :  { %198 = vst.msk [vmem:[%s540_s1 + $0x138] sm:$0xff] %vm158_vm0, %v117_v18  ;;  %166 = vst.msk [vmem:[%s540_s1 + $0x38] sm:$0xff] %vm158_vm0, %v53_v19 }
  0xb3   :  { %v118_v20 = vpop.trf.xlu1  ;;  %v54_v21 = vpop.trf.xlu0 }
  0xb4   :  { %199 = vst.msk [vmem:[%s540_s1 + $0x140] sm:$0xff] %vm158_vm0, %v118_v20  ;;  %167 = vst.msk [vmem:[%s540_s1 + $0x40] sm:$0xff] %vm158_vm0, %v54_v21 }
  0xb7   :  { %v119_v22 = vpop.trf.xlu1  ;;  %v55_v23 = vpop.trf.xlu0 }
  0xb8   :  { %200 = vst.msk [vmem:[%s540_s1 + $0x148] sm:$0xff] %vm158_vm0, %v119_v22  ;;  %168 = vst.msk [vmem:[%s540_s1 + $0x48] sm:$0xff] %vm158_vm0, %v55_v23 }
  0xbb   :  { %v120_v24 = vpop.trf.xlu1  ;;  %v56_v25 = vpop.trf.xlu0 }
  0xbc   :  { %201 = vst.msk [vmem:[%s540_s1 + $0x150] sm:$0xff] %vm158_vm0, %v120_v24  ;;  %169 = vst.msk [vmem:[%s540_s1 + $0x50] sm:$0xff] %vm158_vm0, %v56_v25 }
  0xbf   :  { %v121_v26 = vpop.trf.xlu1  ;;  %v57_v27 = vpop.trf.xlu0 }
  0xc0   :  { %202 = vst.msk [vmem:[%s540_s1 + $0x158] sm:$0xff] %vm158_vm0, %v121_v26  ;;  %170 = vst.msk [vmem:[%s540_s1 + $0x58] sm:$0xff] %vm158_vm0, %v57_v27 }
  0xc3   :  { %v122_v28 = vpop.trf.xlu1  ;;  %v58_v29 = vpop.trf.xlu0 }
  0xc4   :  { %203 = vst.msk [vmem:[%s540_s1 + $0x160] sm:$0xff] %vm158_vm0, %v122_v28  ;;  %171 = vst.msk [vmem:[%s540_s1 + $0x60] sm:$0xff] %vm158_vm0, %v58_v29 }
  0xc7   :  { %v123_v30 = vpop.trf.xlu1  ;;  %v59_v31 = vpop.trf.xlu0 }
  0xc8   :  { %204 = vst.msk [vmem:[%s540_s1 + $0x168] sm:$0xff] %vm158_vm0, %v123_v30  ;;  %172 = vst.msk [vmem:[%s540_s1 + $0x68] sm:$0xff] %vm158_vm0, %v59_v31 }
  0xcb   :  { %v124_v32 = vpop.trf.xlu1  ;;  %v60_v33 = vpop.trf.xlu0 }
  0xcc   :  { %205 = vst.msk [vmem:[%s540_s1 + $0x170] sm:$0xff] %vm158_vm0, %v124_v32  ;;  %173 = vst.msk [vmem:[%s540_s1 + $0x70] sm:$0xff] %vm158_vm0, %v60_v33 }
  0xcf   :  { %v125_v34 = vpop.trf.xlu1  ;;  %v61_v35 = vpop.trf.xlu0 }
  0xd0   :  { %206 = vst.msk [vmem:[%s540_s1 + $0x178] sm:$0xff] %vm158_vm0, %v125_v34  ;;  %174 = vst.msk [vmem:[%s540_s1 + $0x78] sm:$0xff] %vm158_vm0, %v61_v35 }
  0xd3   :  { %v142_v36 = vpop.trf.xlu1  ;;  %v78_v37 = vpop.trf.xlu0 }
  0xd4   :  { %207 = vst.msk [vmem:[%s540_s1 + $0x180] sm:$0xff] %vm158_vm0, %v142_v36  ;;  %175 = vst.msk [vmem:[%s540_s1 + $0x80] sm:$0xff] %vm158_vm0, %v78_v37 }
  0xd7   :  { %v143_v38 = vpop.trf.xlu1  ;;  %v79_v39 = vpop.trf.xlu0 }
  0xd8   :  { %208 = vst.msk [vmem:[%s540_s1 + $0x188] sm:$0xff] %vm158_vm0, %v143_v38  ;;  %176 = vst.msk [vmem:[%s540_s1 + $0x88] sm:$0xff] %vm158_vm0, %v79_v39 }
  0xdb   :  { %v144_v40 = vpop.trf.xlu1  ;;  %v80_v41 = vpop.trf.xlu0 }
  0xdc   :  { %209 = vst.msk [vmem:[%s540_s1 + $0x190] sm:$0xff] %vm158_vm0, %v144_v40  ;;  %177 = vst.msk [vmem:[%s540_s1 + $0x90] sm:$0xff] %vm158_vm0, %v80_v41 }
  0xdf   :  { %v145_v42 = vpop.trf.xlu1  ;;  %v81_v43 = vpop.trf.xlu0 }
  0xe0   :  { %210 = vst.msk [vmem:[%s540_s1 + $0x198] sm:$0xff] %vm158_vm0, %v145_v42  ;;  %178 = vst.msk [vmem:[%s540_s1 + $0x98] sm:$0xff] %vm158_vm0, %v81_v43 }
  0xe3   :  { %v146_v44 = vpop.trf.xlu1  ;;  %v82_v45 = vpop.trf.xlu0 }
  0xe4   :  { %211 = vst.msk [vmem:[%s540_s1 + $0x1a0] sm:$0xff] %vm158_vm0, %v146_v44  ;;  %179 = vst.msk [vmem:[%s540_s1 + $0xa0] sm:$0xff] %vm158_vm0, %v82_v45 }
  0xe7   :  { %v147_v46 = vpop.trf.xlu1  ;;  %v83_v47 = vpop.trf.xlu0 }
  0xe8   :  { %212 = vst.msk [vmem:[%s540_s1 + $0x1a8] sm:$0xff] %vm158_vm0, %v147_v46  ;;  %180 = vst.msk [vmem:[%s540_s1 + $0xa8] sm:$0xff] %vm158_vm0, %v83_v47 }
  0xeb   :  { %v148_v48 = vpop.trf.xlu1  ;;  %v84_v49 = vpop.trf.xlu0 }
  0xec   :  { %213 = vst.msk [vmem:[%s540_s1 + $0x1b0] sm:$0xff] %vm158_vm0, %v148_v48  ;;  %181 = vst.msk [vmem:[%s540_s1 + $0xb0] sm:$0xff] %vm158_vm0, %v84_v49 }
  0xef   :  { %v149_v50 = vpop.trf.xlu1  ;;  %v85_v51 = vpop.trf.xlu0 }
  0xf0   :  { %214 = vst.msk [vmem:[%s540_s1 + $0x1b8] sm:$0xff] %vm158_vm0, %v149_v50  ;;  %182 = vst.msk [vmem:[%s540_s1 + $0xb8] sm:$0xff] %vm158_vm0, %v85_v51 }
  0xf3   :  { %v150_v52 = vpop.trf.xlu1  ;;  %v86_v53 = vpop.trf.xlu0 }
  0xf4   :  { %215 = vst.msk [vmem:[%s540_s1 + $0x1c0] sm:$0xff] %vm158_vm0, %v150_v52  ;;  %183 = vst.msk [vmem:[%s540_s1 + $0xc0] sm:$0xff] %vm158_vm0, %v86_v53 }
  0xf7   :  { %v151_v54 = vpop.trf.xlu1  ;;  %v87_v55 = vpop.trf.xlu0 }
  0xf8   :  { %216 = vst.msk [vmem:[%s540_s1 + $0x1c8] sm:$0xff] %vm158_vm0, %v151_v54  ;;  %184 = vst.msk [vmem:[%s540_s1 + $0xc8] sm:$0xff] %vm158_vm0, %v87_v55 }
  0xfb   :  { %v152_v56 = vpop.trf.xlu1  ;;  %v88_v57 = vpop.trf.xlu0 }
  0xfc   :  { %217 = vst.msk [vmem:[%s540_s1 + $0x1d0] sm:$0xff] %vm158_vm0, %v152_v56  ;;  %185 = vst.msk [vmem:[%s540_s1 + $0xd0] sm:$0xff] %vm158_vm0, %v88_v57 }
  0xff   :  { %v153_v58 = vpop.trf.xlu1  ;;  %v89_v59 = vpop.trf.xlu0 }
 0x100   :  { %218 = vst.msk [vmem:[%s540_s1 + $0x1d8] sm:$0xff] %vm158_vm0, %v153_v58  ;;  %186 = vst.msk [vmem:[%s540_s1 + $0xd8] sm:$0xff] %vm158_vm0, %v89_v59 }
 0x103   :  { %v154_v60 = vpop.trf.xlu1  ;;  %v90_v61 = vpop.trf.xlu0 }
 0x104   :  { %219 = vst.msk [vmem:[%s540_s1 + $0x1e0] sm:$0xff] %vm158_vm0, %v154_v60  ;;  %187 = vst.msk [vmem:[%s540_s1 + $0xe0] sm:$0xff] %vm158_vm0, %v90_v61 }
 0x107   :  { %v155_v62 = vpop.trf.xlu1  ;;  %v91_v63 = vpop.trf.xlu0 }
 0x108   :  { %220 = vst.msk [vmem:[%s540_s1 + $0x1e8] sm:$0xff] %vm158_vm0, %v155_v62  ;;  %188 = vst.msk [vmem:[%s540_s1 + $0xe8] sm:$0xff] %vm158_vm0, %v91_v63 }
 0x10b   :  { %v156_v0 = vpop.trf.xlu1  ;;  %v92_v1 = vpop.trf.xlu0 }
 0x10c   :  { %221 = vst.msk [vmem:[%s540_s1 + $0x1f0] sm:$0xff] %vm158_vm0, %v156_v0  ;;  %189 = vst.msk [vmem:[%s540_s1 + $0xf0] sm:$0xff] %vm158_vm0, %v92_v1 }
 0x10f   :  { %v157_v2 = vpop.trf.xlu1  ;;  %v93_v3 = vpop.trf.xlu0 }
 0x110   :  { %222 = vst.msk [vmem:[%s540_s1 + $0x1f8] sm:$0xff] %vm158_vm0, %v157_v2  ;;  %190 = vst.msk [vmem:[%s540_s1 + $0xf8] sm:$0xff] %vm158_vm0, %v93_v3 }
 0x111   :  { %227 = vsyncpa [#allocation3], 1 }

</bundles_post_ra>
